<compile_context>
chip_gen: v5e
topology: v5e:2x2
jax: 0.10.0
libtpu: 0.0.40
codegen_flags: <defaults>
</compile_context>

<pallas_src>
import jax
import jax.numpy as jnp
from jax.experimental import pallas as pl
from jax.experimental.pallas import tpu as pltpu


def _round_up(v, m):
    return ((v + m - 1) // m) * m


def _mlp_softmax_kernel(in_ref, w1_ref, b1_ref, w2_ref, b2_ref,
                        w3_ref, b3_ref, o_ref):
    """Fused (rows@W1+b1) -> relu -> (@W2+b2) -> relu -> (@W3+b3) -> softmax.

    Matmul operands are bf16 (single MXU pass each); accumulation, bias adds,
    relu and softmax are f32.
    """
    h1 = jnp.dot(in_ref[...], w1_ref[...], preferred_element_type=jnp.float32)
    h1 = jnp.maximum(h1 + b1_ref[...], 0.0)
    # TODO(synk): dropout skipped (eval-mode identity).

    h2 = jnp.dot(h1.astype(jnp.bfloat16), w2_ref[...],
                 preferred_element_type=jnp.float32)
    h2 = jnp.maximum(h2 + b2_ref[...], 0.0)

    logits = jnp.dot(h2.astype(jnp.bfloat16), w3_ref[...],
                     preferred_element_type=jnp.float32)
    logits = logits + b3_ref[...]

    # Stable softmax over the class axis (last dim).  Exact reciprocal of the
    # [rt, 1] denominator (cheap) so rows sum to 1 to f32 precision.
    m = jnp.max(logits, axis=-1, keepdims=True)
    e = jnp.exp(logits - m)
    inv_denom = 1.0 / jnp.sum(e, axis=-1, keepdims=True)
    o_ref[...] = (e * inv_denom).astype(o_ref.dtype)


def baseline_node_classifier(x, op, params, *, row_tile=4096, min_grid_steps=2):
    """Run the fused MLP-softmax kernel.

    x:  [N, x_dim]   float32
    op: [N, op_dim]  float32
    params: dict with w1 [x_dim+op_dim, h], b1 [h], w2 [h, h//2], b2 [h//2],
            w3 [h//2, out], b3 [out]
    """
    n, x_dim = x.shape
    n_op, op_dim = op.shape
    assert n == n_op
    in_dim = x_dim + op_dim
    hid = params["w1"].shape[1]
    hid2 = params["w2"].shape[1]
    out_dim = params["w3"].shape[1]
    assert params["w1"].shape[0] == in_dim

    # Wrapper-side concat (tiny HBM cost) so layer 1 is a single MXU pass.
    # bf16 operands: one MXU pass per dot and half the input DMA bytes.
    inputs = jnp.concatenate([x, op], axis=1).astype(jnp.bfloat16)

    # Row tile: as large as possible to amortize per-grid-step overhead,
    # but capped at the 8-aligned node count and clamped so the grid has at
    # least `min_grid_steps` steps when there is enough work (v7x has 2
    # TensorCores that split the "parallel" axis; a 1-step grid idles one).
    n8 = _round_up(n, 8)
    rt = min(_round_up(row_tile, 8), n8)
    if n8 > 8 * min_grid_steps:
        rt = min(rt, _round_up(pl.cdiv(n8, min_grid_steps), 8))
    rt = max(rt, 8)
    grid = (pl.cdiv(n, rt),)  # ragged last block: Pallas masks tail writes

    # Weights in bf16; biases stay f32 and as [1, F] rows (lane-major 2-D).
    w1 = params["w1"].astype(jnp.bfloat16)
    w2 = params["w2"].astype(jnp.bfloat16)
    w3 = params["w3"].astype(jnp.bfloat16)
    b1 = params["b1"].reshape(1, hid).astype(jnp.float32)
    b2 = params["b2"].reshape(1, hid2).astype(jnp.float32)
    b3 = params["b3"].reshape(1, out_dim).astype(jnp.float32)

    resident = lambda shape: pl.BlockSpec(shape, lambda i: (0, 0))

    out = pl.pallas_call(
        _mlp_softmax_kernel,
        out_shape=jax.ShapeDtypeStruct((n, out_dim), jnp.float32),
        grid_spec=pltpu.PrefetchScalarGridSpec(
            num_scalar_prefetch=0,
            grid=grid,
            in_specs=[
                pl.BlockSpec((rt, in_dim), lambda i: (i, 0)),  # node rows
                resident((in_dim, hid)),     # w1
                resident((1, hid)),          # b1
                resident((hid, hid2)),       # w2
                resident((1, hid2)),         # b2
                resident((hid2, out_dim)),   # w3
                resident((1, out_dim)),      # b3
            ],
            out_specs=pl.BlockSpec((rt, out_dim), lambda i: (i, 0)),
        ),
        compiler_params=pltpu.CompilerParams(
            dimension_semantics=("parallel",)),
    )(inputs, w1, b1, w2, b2, w3, b3)
    return out


def init_params(key, input_dim, hidden_dim, output_dim):
    """Deterministic init; weights stored as [in, out] (transposed nn.Linear)."""
    ks = jax.random.split(key, 6)

    def linear(kw, kb, fan_in, fan_out):
        bound = 1.0 / jnp.sqrt(fan_in)
        w = jax.random.uniform(kw, (fan_in, fan_out), jnp.float32, -bound, bound)
        b = jax.random.uniform(kb, (fan_out,), jnp.float32, -bound, bound)
        return w, b

    w1, b1 = linear(ks[0], ks[1], input_dim, hidden_dim)
    w2, b2 = linear(ks[2], ks[3], hidden_dim, hidden_dim // 2)
    w3, b3 = linear(ks[4], ks[5], hidden_dim // 2, output_dim)
    return dict(w1=w1, b1=b1, w2=w2, b2=b2, w3=w3, b3=b3)


def _reference(x, op, params):
    inputs = jnp.concatenate([x, op], axis=1)
    h1 = jnp.maximum(inputs @ params["w1"] + params["b1"], 0.0)
    h2 = jnp.maximum(h1 @ params["w2"] + params["b2"], 0.0)
    logits = h2 @ params["w3"] + params["b3"]
    return jax.nn.softmax(logits, axis=1)


if __name__ == "__main__":
    X_DIM, OP_DIM = 12, 4
    INPUT_DIM = X_DIM + OP_DIM
    HIDDEN_DIM = 32
    OUTPUT_DIM = 8

    key = jax.random.PRNGKey(0)
    kp, kd = jax.random.split(key)
    params = init_params(kp, INPUT_DIM, HIDDEN_DIM, OUTPUT_DIM)

    # Case 1: tiny node count (8 nodes) -> single small grid step.
    # Case 2: 1000 nodes -> 2-step grid with a ragged (masked) last block.
    for n_nodes in (8, 1000):
        kx, kop, kd = jax.random.split(kd, 3)
        x = jax.random.normal(kx, (n_nodes, X_DIM), jnp.float32)
        op = jax.random.normal(kop, (n_nodes, OP_DIM), jnp.float32)

        out = baseline_node_classifier(x, op, params)
        out = jax.block_until_ready(out)

        assert out.shape == (n_nodes, OUTPUT_DIM)
        # Exact softmax division -> rows sum to 1 to f32 precision.
        assert jnp.allclose(jnp.sum(out, axis=1), 1.0, atol=1e-3)

        # bf16 matmul operands (f32 accumulation) vs. f32 reference.
        ref = _reference(x, op, params)
        assert jnp.allclose(out, ref, atol=5e-3, rtol=5e-3)

    print("KERNEL_OK")
</pallas_src>

<mosaic_0001>
module attributes {stable_mosaic.version = 11 : i64} {
  func.func @_mlp_softmax_kernel(%arg0: i32, %arg1: memref<8x16xbf16, #tpu.memory_space<vmem>>, %arg2: memref<16x32xbf16, #tpu.memory_space<vmem>>, %arg3: memref<1x32xf32, #tpu.memory_space<vmem>>, %arg4: memref<32x16xbf16, #tpu.memory_space<vmem>>, %arg5: memref<1x16xf32, #tpu.memory_space<vmem>>, %arg6: memref<16x8xbf16, #tpu.memory_space<vmem>>, %arg7: memref<1x8xf32, #tpu.memory_space<vmem>>, %arg8: memref<8x8xf32, #tpu.memory_space<vmem>>) attributes {dimension_semantics = [#tpu.dimension_semantics<parallel>], iteration_bounds = array<i64: 1>, scalar_prefetch = 0 : i64, scratch_operands = 0 : i64, tpu.core_type = #tpu.core_type<tc>, window_params = [{transform_indices = @transform_0, window_bounds = array<i64: 8, 16>}, {pipeline_mode = #tpu.pipeline_mode<synchronous>, transform_indices = @transform_1, window_bounds = array<i64: 16, 32>}, {pipeline_mode = #tpu.pipeline_mode<synchronous>, transform_indices = @transform_2, window_bounds = array<i64: 1, 32>}, {pipeline_mode = #tpu.pipeline_mode<synchronous>, transform_indices = @transform_3, window_bounds = array<i64: 32, 16>}, {pipeline_mode = #tpu.pipeline_mode<synchronous>, transform_indices = @transform_4, window_bounds = array<i64: 1, 16>}, {pipeline_mode = #tpu.pipeline_mode<synchronous>, transform_indices = @transform_5, window_bounds = array<i64: 16, 8>}, {pipeline_mode = #tpu.pipeline_mode<synchronous>, transform_indices = @transform_6, window_bounds = array<i64: 1, 8>}, {transform_indices = @transform_7, window_bounds = array<i64: 8, 8>}]} {
    %c0 = arith.constant 0 : index
    %c0_0 = arith.constant 0 : index
    %0 = vector.load %arg1[%c0, %c0_0] : memref<8x16xbf16, #tpu.memory_space<vmem>>, vector<8x16xbf16>
    %c0_1 = arith.constant 0 : index
    %c0_2 = arith.constant 0 : index
    %1 = vector.load %arg2[%c0_1, %c0_2] : memref<16x32xbf16, #tpu.memory_space<vmem>>, vector<16x32xbf16>
    %cst = arith.constant dense<0.000000e+00> : vector<8x32xf32>
    %2 = tpu.matmul %0, %1, %cst {dimension_numbers = #tpu.dot_dimension_numbers<[1], [0], [0], [1], [0, 0, 1, 1], [], []>} : vector<8x16xbf16>, vector<16x32xbf16>, vector<8x32xf32> -> vector<8x32xf32>
    %c0_3 = arith.constant 0 : index
    %c0_4 = arith.constant 0 : index
    %3 = vector.load %arg3[%c0_3, %c0_4] : memref<1x32xf32, #tpu.memory_space<vmem>>, vector<1x32xf32>
    %4 = vector.broadcast %3 : vector<1x32xf32> to vector<8x32xf32>
    %5 = arith.addf %2, %4 : vector<8x32xf32>
    %cst_5 = arith.constant 0.000000e+00 : f32
    %6 = vector.broadcast %cst_5 : f32 to vector<8x32xf32>
    %7 = arith.maximumf %5, %6 : vector<8x32xf32>
    %8 = arith.truncf %7 : vector<8x32xf32> to vector<8x32xbf16>
    %c0_6 = arith.constant 0 : index
    %c0_7 = arith.constant 0 : index
    %9 = vector.load %arg4[%c0_6, %c0_7] : memref<32x16xbf16, #tpu.memory_space<vmem>>, vector<32x16xbf16>
    %cst_8 = arith.constant dense<0.000000e+00> : vector<8x16xf32>
    %10 = tpu.matmul %8, %9, %cst_8 {dimension_numbers = #tpu.dot_dimension_numbers<[1], [0], [0], [1], [0, 0, 1, 1], [], []>} : vector<8x32xbf16>, vector<32x16xbf16>, vector<8x16xf32> -> vector<8x16xf32>
    %c0_9 = arith.constant 0 : index
    %c0_10 = arith.constant 0 : index
    %11 = vector.load %arg5[%c0_9, %c0_10] : memref<1x16xf32, #tpu.memory_space<vmem>>, vector<1x16xf32>
    %12 = vector.broadcast %11 : vector<1x16xf32> to vector<8x16xf32>
    %13 = arith.addf %10, %12 : vector<8x16xf32>
    %cst_11 = arith.constant 0.000000e+00 : f32
    %14 = vector.broadcast %cst_11 : f32 to vector<8x16xf32>
    %15 = arith.maximumf %13, %14 : vector<8x16xf32>
    %16 = arith.truncf %15 : vector<8x16xf32> to vector<8x16xbf16>
    %c0_12 = arith.constant 0 : index
    %c0_13 = arith.constant 0 : index
    %17 = vector.load %arg6[%c0_12, %c0_13] : memref<16x8xbf16, #tpu.memory_space<vmem>>, vector<16x8xbf16>
    %cst_14 = arith.constant dense<0.000000e+00> : vector<8x8xf32>
    %18 = tpu.matmul %16, %17, %cst_14 {dimension_numbers = #tpu.dot_dimension_numbers<[1], [0], [0], [1], [0, 0, 1, 1], [], []>} : vector<8x16xbf16>, vector<16x8xbf16>, vector<8x8xf32> -> vector<8x8xf32>
    %c0_15 = arith.constant 0 : index
    %c0_16 = arith.constant 0 : index
    %19 = vector.load %arg7[%c0_15, %c0_16] : memref<1x8xf32, #tpu.memory_space<vmem>>, vector<1x8xf32>
    %20 = vector.broadcast %19 : vector<1x8xf32> to vector<8x8xf32>
    %21 = arith.addf %18, %20 : vector<8x8xf32>
    %cst_17 = arith.constant dense<0xFF800000> : vector<8xf32>
    %22 = vector.multi_reduction <maximumf>, %21, %cst_17 [1] : vector<8x8xf32> to vector<8xf32>
    %23 = vector.shape_cast %22 : vector<8xf32> to vector<8x1xf32>
    %24 = vector.broadcast %23 : vector<8x1xf32> to vector<8x8xf32>
    %25 = arith.subf %21, %24 : vector<8x8xf32>
    %26 = math.exp %25 : vector<8x8xf32>
    %cst_18 = arith.constant dense<0.000000e+00> : vector<8xf32>
    %27 = vector.multi_reduction <add>, %26, %cst_18 [1] : vector<8x8xf32> to vector<8xf32>
    %28 = vector.shape_cast %27 : vector<8xf32> to vector<8x1xf32>
    %cst_19 = arith.constant 1.000000e+00 : f32
    %29 = vector.broadcast %cst_19 : f32 to vector<8x1xf32>
    %30 = arith.divf %29, %28 : vector<8x1xf32>
    %31 = vector.broadcast %30 : vector<8x1xf32> to vector<8x8xf32>
    %32 = arith.mulf %26, %31 : vector<8x8xf32>
    %c0_20 = arith.constant 0 : index
    %c0_21 = arith.constant 0 : index
    %33 = vector.load %arg8[%c0_20, %c0_21] : memref<8x8xf32, #tpu.memory_space<vmem>>, vector<8x8xf32>
    tpu.vector_store %arg8[%c0_20, %c0_21], %32 {strides = array<i32>} : memref<8x8xf32, #tpu.memory_space<vmem>>, vector<8x8xf32>,
    return
  }
  func.func @transform_0(%arg0: i32) -> (i32, i32) {
    %c0_i32 = arith.constant 0 : i32
    %c0_i32_0 = arith.constant 0 : i32
    return %arg0, %c0_i32 : i32, i32
  }
  func.func @transform_1(%arg0: i32) -> (i32, i32) {
    %c0_i32 = arith.constant 0 : i32
    %c0_i32_0 = arith.constant 0 : i32
    %c0_i32_1 = arith.constant 0 : i32
    return %c0_i32, %c0_i32_0 : i32, i32
  }
  func.func @transform_2(%arg0: i32) -> (i32, i32) {
    %c0_i32 = arith.constant 0 : i32
    %c0_i32_0 = arith.constant 0 : i32
    %c0_i32_1 = arith.constant 0 : i32
    return %c0_i32, %c0_i32_0 : i32, i32
  }
  func.func @transform_3(%arg0: i32) -> (i32, i32) {
    %c0_i32 = arith.constant 0 : i32
    %c0_i32_0 = arith.constant 0 : i32
    %c0_i32_1 = arith.constant 0 : i32
    return %c0_i32, %c0_i32_0 : i32, i32
  }
  func.func @transform_4(%arg0: i32) -> (i32, i32) {
    %c0_i32 = arith.constant 0 : i32
    %c0_i32_0 = arith.constant 0 : i32
    %c0_i32_1 = arith.constant 0 : i32
    return %c0_i32, %c0_i32_0 : i32, i32
  }
  func.func @transform_5(%arg0: i32) -> (i32, i32) {
    %c0_i32 = arith.constant 0 : i32
    %c0_i32_0 = arith.constant 0 : i32
    %c0_i32_1 = arith.constant 0 : i32
    return %c0_i32, %c0_i32_0 : i32, i32
  }
  func.func @transform_6(%arg0: i32) -> (i32, i32) {
    %c0_i32 = arith.constant 0 : i32
    %c0_i32_0 = arith.constant 0 : i32
    %c0_i32_1 = arith.constant 0 : i32
    return %c0_i32, %c0_i32_0 : i32, i32
  }
  func.func @transform_7(%arg0: i32) -> (i32, i32) {
    %c0_i32 = arith.constant 0 : i32
    %c0_i32_0 = arith.constant 0 : i32
    return %arg0, %c0_i32 : i32, i32
  }
}

</mosaic_0001>

<bundles_post_ra>
// kernel: tpu_custom_call.1
= control target key start
LH: loop header
LB: loop body
LE: loop exit
PB: predicated region body
PF: predicated region fallthrough
CT: control target
= control target key end

     0   :  { %vm41_vm0 = vcmask 130048   ;;  %s300_s0 = inlined_call_operand.vmem [shape: bf16[8,16], index: 0, kind: input, shape index: {}]   ;;  %s301_s1 = inlined_call_operand.vmem [shape: bf16[16,32], index: 1, kind: input, shape index: {}]   ;;  %s302_s2 = inlined_call_operand.vmem [shape: f32[1,32], index: 2, kind: input, shape index: {}]   ;;  %s303_s3 = inlined_call_operand.vmem [shape: bf16[32,16], index: 3, kind: input, shape index: {}]   ;;  %s304_s4 = inlined_call_operand.vmem [shape: f32[1,16], index: 4, kind: input, shape index: {}]   ;;  %s305_s5 = inlined_call_operand.vmem [shape: bf16[16,8], index: 5, kind: input, shape index: {}]   ;;  %s306_s6 = inlined_call_operand.vmem [shape: f32[1,8], index: 6, kind: input, shape index: {}]   ;;  %s307_s7 = inlined_call_operand.hbm [shape: f32[8,8], index: 7, kind: output, shape index: {}]  }
   0x1   :  { %v189_v0 = vld [vmem:[%s301_s1] sm:$0xff] }
   0x2   :  { %52 = vmatpush.bf16.msra.mxu0 %v189_v0  ;;  %v28_v1 = vld [vmem:[%s300_s0] sm:$0xf] }
   0x3   :  { %12 = vsyncpa [#allocation3], 0  ;;  %v191_v2 = vld [vmem:[%s303_s3 + $0x8] sm:$0xff]  ;;  %v190_v3 = vld [vmem:[%s303_s3] sm:$0xff]  ;;  %vm80_vm1 = vcmask 261120   ;;  %vm127_vm2 = vcmask 64512  }
   0x4   :  { %90 = vmatpush.bf16.msra.mxu1 %v191_v2  ;;  %v194_v4 = vld [vmem:[%s302_s2] ss:$0 sm:$0xff]  ;;  %s161_s14 = sshll.u32 %s307_s7, 4  ;;  %s162_s14 = int_to_ptr.hbm [resolvable:$true] %s161_s14 }
   0x5   :  { %174 = vmatmul.msk.bf16.vlgmr.msra.gmra.mxu0 %vm41_vm0, %v28_v1  ;;  %v192_v10 = vld [vmem:[%s305_s5] sm:$0xff] }
   0x6   :  { %121 = vmatpush.bf16.msra.mxu2 %v192_v10  ;;  %v195_v11 = vld [vmem:[%s304_s4] ss:$0 sm:$0xff]  ;;  %s227_s4 = smov [#allocation2]  }
   0x7   :  { %v196_v17 = vld [vmem:[%s306_s6] ss:$0 sm:$0xff]  ;;  %s159_s5 = sshll.u32 %s227_s4, 4  ;;  %s160_s5 = int_to_ptr.vmem [resolvable:$true] %s159_s5 }
   0x8   :  { %91 = vmatpush.bf16.msra.mxu1 %v190_v3 }
  0x82   :  { %v54_v5 = vpop.f32.mrf.mxu0 }
  0x83   :  { %v55_v6 = vadd.f32 %v194_v4, %v54_v5 }
  0x85   :  { %v58_v7 = vmax.f32 %v55_v6, 0.0 }
  0x87   :  { %v59_v8 = vpack.c.bf16 %v58_v7, %v58_v7 }
  0x89   :  { %183 = vmatmul.msk.bf16.vlgmr.msra.gmra.mxu1 %vm80_vm1, %v59_v8 }
  0x8a   :  { %v56_v9 = vpop.f32.mrf.mxu0 }
 0x106   :  { %v93_v12 = vpop.f32.mrf.mxu1 }
 0x107   :  { %v94_v13 = vadd.f32 %v195_v11, %v93_v12 }
 0x109   :  { %v97_v14 = vmax.f32 %v94_v13, 0.0 }
 0x10b   :  { %v98_v15 = vpack.c.bf16 %v97_v14, %v97_v14 }
 0x10d   :  { %188 = vmatmul.msk.bf16.vlgmr.msra.gmra.mxu2 %vm41_vm0, %v98_v15 }
 0x10e   :  { %v95_v16 = vpop.f32.mrf.mxu1 }
 0x190   :  { %v123_v18 = vpop.f32.mrf.mxu2 }
 0x191   :  { %v124_v19 = vadd.f32 %v196_v17, %v123_v18 }
 0x193   :  { %v128_v20 = vsel %vm127_vm2, %v124_v19, -inf }
 0x194   :  { %129 = vmax.xlane.f32.xlu0 %v128_v20 }
 0x198   :  { %v125_v21 = vpop.f32.mrf.mxu2 }
 0x207   :  { %v130_v22 = vpop.xlane.xlu0 %129 }
 0x208   :  { %v131_v23 = vsub.f32 %v124_v19, %v130_v22 }
 0x20a   :  { %v132_v24 = vmul.f32 1.442695, %v131_v23 }
 0x20c   :  { %197 = vpow2.f32 %v132_v24 }
 0x212   :  { %v198_v25 = vpop.eup %197 }
 0x213   :  { %v134_v26 = vsel %vm127_vm2, %v198_v25, 0.0 }
 0x214   :  { %135 = vadd.xlane.f32.xlu0 %v134_v26 }
 0x287   :  { %v136_v27 = vpop.xlane.xlu0 %135 }
 0x288   :  { %199 = vrcp.f32 %v136_v27  ;;  %v148_v31 = vand.u32 2147483648, %v136_v27  ;;  %v146_v33 = vand.u32 2147483647, %v136_v27  ;;  %vm142_vm4 = vweird.f32 %v136_v27 }
 0x28a   :  { %v149_v35 = vor.u32 1.1754944e-38, %v148_v31  ;;  %vm147_vm6 = vcmp.eq.f32.partialorder %v146_v33, 8.507059e+37 }
 0x28e   :  { %v200_v28 = vpop.eup %199 }
 0x28f   :  { %v138_v29 = vmul.f32 %v200_v28, %v136_v27  ;;  %vm143_vm3 = vweird.f32 %v200_v28 }
 0x290   :  { %vm144_vm5 = vmor %vm142_vm4, %vm143_vm3 }
 0x291   :  { %v139_v30 = vsub.f32 1.0, %v138_v29 }
 0x293   :  { %v140_v32 = vmul.f32 %v200_v28, %v139_v30 }
 0x295   :  { %v141_v34 = vadd.f32 %v200_v28, %v140_v32 }
 0x297   :  { %v145_v36 = vsel %vm144_vm5, %v200_v28, %v141_v34 }
 0x298   :  { %v150_v37 = vsel %vm147_vm6, %v149_v35, %v145_v36 }
 0x299   :  { %v152_v38 = vmul.f32 %v198_v25, %v150_v37 }
 0x29b   :  { %153 = vst.msk [vmem:[#allocation2] sm:$0xff] %vm127_vm2, %v152_v38 }
 0x29c   :  { %164 = dma.vmem_to_hbm [thread:$0]  %s160_s5, 128, %s162_s14, [#allocation3]  }
 0x29d   :  { %225 = dma.done.wait [#allocation3], 128  }
 0x29e   :  { %226 = vsyncadd [#allocation3], 4294967168 }
 0x29f   :  { %169 = vsyncpa [#allocation3], 1 }

</bundles_post_ra>
